<compile_context>
chip_gen: v7x
topology: tpu7x:2x2x1
jax: 0.10.0
libtpu: 0.0.40
codegen_flags: <defaults>
</compile_context>

<pallas_src>
import math
from functools import partial

import jax
import jax.numpy as jnp
from jax import lax
from jax.experimental import pallas as pl
from jax.experimental.pallas import tpu as pltpu

BN_EPS = 1e-5


def _round_up(n, m=128):
    return ((n + m - 1) // m) * m


def _bn_relu(h, gamma, beta, inv_n, valid):
    """Training-mode BatchNorm1d (biased var, two-pass) fused with ReLU.

    `valid` is an optional (Bp,1) {0,1} mask excluding batch-pad rows from the
    statistics; `inv_n` is 1/real_batch (compile-time constant)."""
    hm = h if valid is None else h * valid
    mean = jnp.sum(hm, axis=0, keepdims=True) * inv_n
    centered = h - mean
    if valid is not None:
        centered = centered * valid
    var = jnp.sum(centered * centered, axis=0, keepdims=True) * inv_n
    scale = gamma * lax.rsqrt(var + BN_EPS)          # rsqrt -> EUP slot
    shift = beta - mean * scale
    return jnp.maximum(h * scale + shift, 0.0)       # one mul + add + max


def actor_kernel(x_ref, w1_ref, w2_ref, w3_ref, vec_ref, o_ref,
                 *, h1_p, h2_p, ad_p, real_b, action_scale):
    bp = x_ref.shape[0]
    inv_n = 1.0 / float(real_b)

    valid = None
    if bp != real_b:                                 # static (trace-time) branch
        row_ids = lax.broadcasted_iota(jnp.int32, (bp, 1), 0)
        valid = (row_ids < real_b).astype(jnp.float32)

    # All per-layer vectors arrive as one packed (8, maxN) f32 operand.
    vecs = vec_ref[...]
    g1, be1 = vecs[0:1, :h1_p], vecs[1:2, :h1_p]
    g2, be2 = vecs[2:3, :h2_p], vecs[3:4, :h2_p]
    b3 = vecs[4:5, :ad_p]

    x = x_ref[...]                                   # already bf16

    # ---- layer1 + BN + relu  (Linear bias omitted: cancelled by BN mean) ---
    h1 = jnp.dot(x, w1_ref[...], preferred_element_type=jnp.float32)
    h1 = _bn_relu(h1, g1, be1, inv_n, valid).astype(jnp.bfloat16)

    # ---- layer2 + BN + relu -------------------------------------------------
    h2 = jnp.dot(h1, w2_ref[...], preferred_element_type=jnp.float32)
    h2 = _bn_relu(h2, g2, be2, inv_n, valid).astype(jnp.bfloat16)

    # ---- layer3 + tanh + scale ----------------------------------------------
    h3 = jnp.dot(h2, w3_ref[...], preferred_element_type=jnp.float32) + b3
    o_ref[...] = jnp.tanh(h3) * action_scale


def init_params(key, state_dim, action_dim):
    """Unpadded fp32 params mirroring Actor_net.intial_parameters shapes.

    Weights are stored pre-transposed as (in_features, out_features).
    b1/b2 are kept for the fp32 reference but are NOT kernel operands
    (training-mode BN cancels them)."""
    k = jax.random.split(key, 6)
    r1 = 1.0 / math.sqrt(400.0)
    r2 = 1.0 / math.sqrt(300.0)
    return {
        "w1": jax.random.uniform(k[0], (state_dim, 400), jnp.float32, -r1, r1),
        "b1": jax.random.uniform(k[1], (1, 400), jnp.float32, -r1, r1),
        "g1": jnp.ones((1, 400), jnp.float32),
        "be1": jnp.zeros((1, 400), jnp.float32),
        "w2": jax.random.uniform(k[2], (400, 300), jnp.float32, -r2, r2),
        "b2": jax.random.uniform(k[3], (1, 300), jnp.float32, -r2, r2),
        "g2": jnp.ones((1, 300), jnp.float32),
        "be2": jnp.zeros((1, 300), jnp.float32),
        "w3": jax.random.uniform(k[4], (300, action_dim), jnp.float32, -0.003, 0.003),
        "b3": jax.random.uniform(k[5], (1, action_dim), jnp.float32, -0.0003, 0.0003),
    }


def pad_params_for_kernel(p):
    """Zero-pad feature dims to multiples of 128; weights -> bf16; pack vectors."""
    def pad2(a, rows, cols):
        return jnp.zeros((rows, cols), a.dtype).at[: a.shape[0], : a.shape[1]].set(a)

    sd, h1 = p["w1"].shape
    h2 = p["w2"].shape[1]
    ad = p["w3"].shape[1]
    sd_p, h1_p, h2_p, ad_p = (_round_up(d) for d in (sd, h1, h2, ad))
    maxw = max(h1_p, h2_p, ad_p)

    # One packed (8, maxw) f32 operand for gamma/beta/b3 (single DMA instead of
    # five).  Padded columns (gamma=beta=0) keep padded features exactly 0
    # through BN/ReLU so they never pollute the next layer.
    vecs = jnp.zeros((8, maxw), jnp.float32)
    vecs = vecs.at[0, :h1].set(p["g1"][0])
    vecs = vecs.at[1, :h1].set(p["be1"][0])
    vecs = vecs.at[2, :h2].set(p["g2"][0])
    vecs = vecs.at[3, :h2].set(p["be2"][0])
    vecs = vecs.at[4, :ad].set(p["b3"][0])

    return {
        "w1": pad2(p["w1"], sd_p, h1_p).astype(jnp.bfloat16),
        "w2": pad2(p["w2"], h1_p, h2_p).astype(jnp.bfloat16),
        "w3": pad2(p["w3"], h2_p, ad_p).astype(jnp.bfloat16),
        "vecs": vecs,
        "dims": (sd_p, h1_p, h2_p, ad_p),
        "action_dim": ad,
    }


def actor_net_forward(x, kp, action_space_scale):
    """x: (B, state_dim) float32.  kp: padded params from pad_params_for_kernel."""
    B, sd = x.shape
    sd_p, h1_p, h2_p, ad_p = kp["dims"]
    b_p = _round_up(B, 8)                            # sublane-align the batch

    # Lane-align features, sublane-align batch, feed x in bf16 (MXU dtype).
    xb = jnp.zeros((b_p, sd_p), jnp.bfloat16).at[:B, :sd].set(x.astype(jnp.bfloat16))

    vmem = pl.BlockSpec(memory_space=pltpu.MemorySpace.VMEM)
    out_padded = pl.pallas_call(
        partial(actor_kernel, h1_p=h1_p, h2_p=h2_p, ad_p=ad_p,
                real_b=B, action_scale=float(action_space_scale)),
        out_shape=jax.ShapeDtypeStruct((b_p, ad_p), jnp.float32),
        in_specs=[vmem] * 5,
        out_specs=vmem,
        compiler_params=pltpu.CompilerParams(
            # Budget against v7x's 64 MiB physical VMEM; far above this
            # kernel's ~0.7 MB footprint, well below the physical cap.
            vmem_limit_bytes=48 << 20),
    )(xb, kp["w1"], kp["w2"], kp["w3"], kp["vecs"])
    return out_padded[:B, :kp["action_dim"]]


# ----------------------------- references --------------------------------
def _bn_train_ref(h, gamma, beta):
    mean = jnp.mean(h, axis=0, keepdims=True)
    var = jnp.mean((h - mean) ** 2, axis=0, keepdims=True)
    return (h - mean) * lax.rsqrt(var + BN_EPS) * gamma + beta


def actor_net_reference_fp32(x, p, action_space_scale):
    """Pure fp32, unpadded reference (matches the PyTorch forward, incl. b1/b2)."""
    h1 = jnp.maximum(_bn_train_ref(x @ p["w1"] + p["b1"], p["g1"], p["be1"]), 0.0)
    h2 = jnp.maximum(_bn_train_ref(h1 @ p["w2"] + p["b2"], p["g2"], p["be2"]), 0.0)
    return jnp.tanh(h2 @ p["w3"] + p["b3"]) * action_space_scale


def actor_net_reference_matched(x, kp, action_space_scale):
    """Pure-JAX replica of the kernel math (bf16 matmul inputs, fp32 accum,
    no b1/b2, statistics over the real batch only)."""
    B, sd = x.shape
    sd_p, h1_p, h2_p, ad_p = kp["dims"]
    xb = jnp.zeros((B, sd_p), jnp.bfloat16).at[:, :sd].set(x.astype(jnp.bfloat16))

    def bn_relu(h, gamma, beta):
        mean = jnp.mean(h, axis=0, keepdims=True)
        var = jnp.mean((h - mean) ** 2, axis=0, keepdims=True)
        return jnp.maximum((h - mean) * lax.rsqrt(var + BN_EPS) * gamma + beta, 0.0)

    v = kp["vecs"]
    g1, be1 = v[0:1, :h1_p], v[1:2, :h1_p]
    g2, be2 = v[2:3, :h2_p], v[3:4, :h2_p]
    b3 = v[4:5, :ad_p]

    h1 = jnp.dot(xb, kp["w1"], preferred_element_type=jnp.float32)
    h1 = bn_relu(h1, g1, be1).astype(jnp.bfloat16)
    h2 = jnp.dot(h1, kp["w2"], preferred_element_type=jnp.float32)
    h2 = bn_relu(h2, g2, be2).astype(jnp.bfloat16)
    h3 = jnp.dot(h2, kp["w3"], preferred_element_type=jnp.float32) + b3
    return (jnp.tanh(h3) * action_space_scale)[:, :kp["action_dim"]]


if __name__ == "__main__":
    key = jax.random.PRNGKey(0)
    k_param, k_x = jax.random.split(key)

    state_dim, action_dim = 16, 4
    action_space_scale = 2.0

    params = init_params(k_param, state_dim, action_dim)
    kp = pad_params_for_kernel(params)

    # ---- Case 1: batch already sublane-aligned (B = 8) -----------------
    x8 = jax.random.normal(k_x, (8, state_dim), dtype=jnp.float32)
    out8 = jax.block_until_ready(actor_net_forward(x8, kp, action_space_scale))
    assert out8.shape == (8, action_dim)

    ref8 = actor_net_reference_matched(x8, kp, action_space_scale)
    assert jnp.allclose(out8, ref8, atol=1e-3, rtol=1e-3), "mismatch vs matched ref (B=8)"

    ref8_fp32 = actor_net_reference_fp32(x8, params, action_space_scale)
    assert jnp.allclose(out8, ref8_fp32, atol=5e-2, rtol=5e-2), "mismatch vs fp32 ref (B=8)"

    # ---- Case 2: ragged batch (B = 5) exercises masked BN statistics ----
    x5 = x8[:5]
    out5 = jax.block_until_ready(actor_net_forward(x5, kp, action_space_scale))
    assert out5.shape == (5, action_dim)

    ref5 = actor_net_reference_matched(x5, kp, action_space_scale)
    assert jnp.allclose(out5, ref5, atol=1e-3, rtol=1e-3), "mismatch vs matched ref (B=5)"

    ref5_fp32 = actor_net_reference_fp32(x5, params, action_space_scale)
    assert jnp.allclose(out5, ref5_fp32, atol=5e-2, rtol=5e-2), "mismatch vs fp32 ref (B=5)"

    print("KERNEL_OK")
</pallas_src>

<mosaic_0001>
module attributes {stable_mosaic.version = 11 : i64} {
  func.func @actor_kernel(%arg0: memref<8x128xbf16, #tpu.memory_space<vmem>>, %arg1: memref<128x512xbf16, #tpu.memory_space<vmem>>, %arg2: memref<512x384xbf16, #tpu.memory_space<vmem>>, %arg3: memref<384x128xbf16, #tpu.memory_space<vmem>>, %arg4: memref<8x512xf32, #tpu.memory_space<vmem>>, %arg5: memref<8x128xf32, #tpu.memory_space<vmem>>) attributes {dimension_semantics = [], scalar_prefetch = 0 : i64, scratch_operands = 0 : i64, tpu.core_type = #tpu.core_type<tc>} {
    %c0 = arith.constant 0 : index
    %c0_0 = arith.constant 0 : index
    %0 = vector.load %arg4[%c0, %c0_0] : memref<8x512xf32, #tpu.memory_space<vmem>>, vector<8x512xf32>
    %1 = vector.extract_strided_slice %0 {offsets = [0, 0], sizes = [1, 512], strides = [1, 1]} : vector<8x512xf32> to vector<1x512xf32>
    %2 = vector.extract_strided_slice %0 {offsets = [1, 0], sizes = [1, 512], strides = [1, 1]} : vector<8x512xf32> to vector<1x512xf32>
    %3 = vector.extract_strided_slice %0 {offsets = [2, 0], sizes = [1, 384], strides = [1, 1]} : vector<8x512xf32> to vector<1x384xf32>
    %4 = vector.extract_strided_slice %0 {offsets = [3, 0], sizes = [1, 384], strides = [1, 1]} : vector<8x512xf32> to vector<1x384xf32>
    %5 = vector.extract_strided_slice %0 {offsets = [4, 0], sizes = [1, 128], strides = [1, 1]} : vector<8x512xf32> to vector<1x128xf32>
    %c0_1 = arith.constant 0 : index
    %c0_2 = arith.constant 0 : index
    %6 = vector.load %arg0[%c0_1, %c0_2] : memref<8x128xbf16, #tpu.memory_space<vmem>>, vector<8x128xbf16>
    %c0_3 = arith.constant 0 : index
    %c0_4 = arith.constant 0 : index
    %7 = vector.load %arg1[%c0_3, %c0_4] : memref<128x512xbf16, #tpu.memory_space<vmem>>, vector<128x512xbf16>
    %cst = arith.constant dense<0.000000e+00> : vector<8x512xf32>
    %8 = tpu.matmul %6, %7, %cst {dimension_numbers = #tpu.dot_dimension_numbers<[1], [0], [0], [1], [0, 0, 1, 1], [], []>} : vector<8x128xbf16>, vector<128x512xbf16>, vector<8x512xf32> -> vector<8x512xf32>
    %cst_5 = arith.constant dense<0.000000e+00> : vector<512xf32>
    %9 = vector.multi_reduction <add>, %8, %cst_5 [0] : vector<8x512xf32> to vector<512xf32>
    %10 = vector.shape_cast %9 : vector<512xf32> to vector<1x512xf32>
    %cst_6 = arith.constant 1.250000e-01 : f32
    %11 = vector.broadcast %cst_6 : f32 to vector<1x512xf32>
    %12 = arith.mulf %10, %11 : vector<1x512xf32>
    %13 = vector.broadcast %12 : vector<1x512xf32> to vector<8x512xf32>
    %14 = arith.subf %8, %13 : vector<8x512xf32>
    %15 = arith.mulf %14, %14 : vector<8x512xf32>
    %cst_7 = arith.constant dense<0.000000e+00> : vector<512xf32>
    %16 = vector.multi_reduction <add>, %15, %cst_7 [0] : vector<8x512xf32> to vector<512xf32>
    %17 = vector.shape_cast %16 : vector<512xf32> to vector<1x512xf32>
    %cst_8 = arith.constant 1.250000e-01 : f32
    %18 = vector.broadcast %cst_8 : f32 to vector<1x512xf32>
    %19 = arith.mulf %17, %18 : vector<1x512xf32>
    %cst_9 = arith.constant 9.99999974E-6 : f32
    %20 = vector.broadcast %cst_9 : f32 to vector<1x512xf32>
    %21 = arith.addf %19, %20 : vector<1x512xf32>
    %22 = math.rsqrt %21 : vector<1x512xf32>
    %23 = arith.mulf %1, %22 : vector<1x512xf32>
    %24 = arith.mulf %12, %23 : vector<1x512xf32>
    %25 = arith.subf %2, %24 : vector<1x512xf32>
    %26 = vector.broadcast %23 : vector<1x512xf32> to vector<8x512xf32>
    %27 = arith.mulf %8, %26 : vector<8x512xf32>
    %28 = vector.broadcast %25 : vector<1x512xf32> to vector<8x512xf32>
    %29 = arith.addf %27, %28 : vector<8x512xf32>
    %cst_10 = arith.constant 0.000000e+00 : f32
    %30 = vector.broadcast %cst_10 : f32 to vector<8x512xf32>
    %31 = arith.maximumf %29, %30 : vector<8x512xf32>
    %32 = arith.truncf %31 : vector<8x512xf32> to vector<8x512xbf16>
    %c0_11 = arith.constant 0 : index
    %c0_12 = arith.constant 0 : index
    %33 = vector.load %arg2[%c0_11, %c0_12] : memref<512x384xbf16, #tpu.memory_space<vmem>>, vector<512x384xbf16>
    %cst_13 = arith.constant dense<0.000000e+00> : vector<8x384xf32>
    %34 = tpu.matmul %32, %33, %cst_13 {dimension_numbers = #tpu.dot_dimension_numbers<[1], [0], [0], [1], [0, 0, 1, 1], [], []>} : vector<8x512xbf16>, vector<512x384xbf16>, vector<8x384xf32> -> vector<8x384xf32>
    %cst_14 = arith.constant dense<0.000000e+00> : vector<384xf32>
    %35 = vector.multi_reduction <add>, %34, %cst_14 [0] : vector<8x384xf32> to vector<384xf32>
    %36 = vector.shape_cast %35 : vector<384xf32> to vector<1x384xf32>
    %cst_15 = arith.constant 1.250000e-01 : f32
    %37 = vector.broadcast %cst_15 : f32 to vector<1x384xf32>
    %38 = arith.mulf %36, %37 : vector<1x384xf32>
    %39 = vector.broadcast %38 : vector<1x384xf32> to vector<8x384xf32>
    %40 = arith.subf %34, %39 : vector<8x384xf32>
    %41 = arith.mulf %40, %40 : vector<8x384xf32>
    %cst_16 = arith.constant dense<0.000000e+00> : vector<384xf32>
    %42 = vector.multi_reduction <add>, %41, %cst_16 [0] : vector<8x384xf32> to vector<384xf32>
    %43 = vector.shape_cast %42 : vector<384xf32> to vector<1x384xf32>
    %cst_17 = arith.constant 1.250000e-01 : f32
    %44 = vector.broadcast %cst_17 : f32 to vector<1x384xf32>
    %45 = arith.mulf %43, %44 : vector<1x384xf32>
    %cst_18 = arith.constant 9.99999974E-6 : f32
    %46 = vector.broadcast %cst_18 : f32 to vector<1x384xf32>
    %47 = arith.addf %45, %46 : vector<1x384xf32>
    %48 = math.rsqrt %47 : vector<1x384xf32>
    %49 = arith.mulf %3, %48 : vector<1x384xf32>
    %50 = arith.mulf %38, %49 : vector<1x384xf32>
    %51 = arith.subf %4, %50 : vector<1x384xf32>
    %52 = vector.broadcast %49 : vector<1x384xf32> to vector<8x384xf32>
    %53 = arith.mulf %34, %52 : vector<8x384xf32>
    %54 = vector.broadcast %51 : vector<1x384xf32> to vector<8x384xf32>
    %55 = arith.addf %53, %54 : vector<8x384xf32>
    %cst_19 = arith.constant 0.000000e+00 : f32
    %56 = vector.broadcast %cst_19 : f32 to vector<8x384xf32>
    %57 = arith.maximumf %55, %56 : vector<8x384xf32>
    %58 = arith.truncf %57 : vector<8x384xf32> to vector<8x384xbf16>
    %c0_20 = arith.constant 0 : index
    %c0_21 = arith.constant 0 : index
    %59 = vector.load %arg3[%c0_20, %c0_21] : memref<384x128xbf16, #tpu.memory_space<vmem>>, vector<384x128xbf16>
    %cst_22 = arith.constant dense<0.000000e+00> : vector<8x128xf32>
    %60 = tpu.matmul %58, %59, %cst_22 {dimension_numbers = #tpu.dot_dimension_numbers<[1], [0], [0], [1], [0, 0, 1, 1], [], []>} : vector<8x384xbf16>, vector<384x128xbf16>, vector<8x128xf32> -> vector<8x128xf32>
    %61 = vector.broadcast %5 : vector<1x128xf32> to vector<8x128xf32>
    %62 = arith.addf %60, %61 : vector<8x128xf32>
    %63 = math.tanh %62 : vector<8x128xf32>
    %cst_23 = arith.constant 2.000000e+00 : f32
    %64 = vector.broadcast %cst_23 : f32 to vector<8x128xf32>
    %65 = arith.mulf %63, %64 : vector<8x128xf32>
    %c0_24 = arith.constant 0 : index
    %c0_25 = arith.constant 0 : index
    %66 = vector.load %arg5[%c0_24, %c0_25] : memref<8x128xf32, #tpu.memory_space<vmem>>, vector<8x128xf32>
    tpu.vector_store %arg5[%c0_24, %c0_25], %65 {strides = array<i32>} : memref<8x128xf32, #tpu.memory_space<vmem>>, vector<8x128xf32>,
    return
  }
}

</mosaic_0001>

<bundles_post_ra>
// kernel: tpu_custom_call.1
= control target key start
LH: loop header
LB: loop body
LE: loop exit
PB: predicated region body
PF: predicated region fallthrough
CT: control target
= control target key end

     0   :  { %10 = vsyncpa [#allocation3], 0  ;;  %s2558_s0 = inlined_call_operand.hbm [shape: bf16[8,128], index: 0, kind: input, shape index: {}]   ;;  %s2559_s1 = inlined_call_operand.hbm [shape: bf16[128,512], index: 1, kind: input, shape index: {}]   ;;  %s2560_s2 = inlined_call_operand.hbm [shape: bf16[512,384], index: 2, kind: input, shape index: {}]   ;;  %s2561_s3 = inlined_call_operand.hbm [shape: bf16[384,128], index: 3, kind: input, shape index: {}]   ;;  %s2562_s4 = inlined_call_operand.hbm [shape: f32[8,512], index: 4, kind: input, shape index: {}]   ;;  %s2563_s5 = inlined_call_operand.hbm [shape: f32[8,128], index: 5, kind: output, shape index: {}]  }
   0x1   :  { %11 = vsyncpa [#allocation6], 0 }
   0x2   :  { %12 = vsyncpa [#allocation9], 0 }
   0x3   :  { %13 = vsyncpa [#allocation4], 0  ;;  %s2337_s18 = smov [#allocation5]   ;;  %s2197_s22 = scalar_lea.hbm %s2559_s1, 4096 }
   0x4   :  { %s29_s19 = sshll.u32 %s2337_s18, 4  ;;  %p2198_p0 = scmp.ne.s32.totalorder %s2559_s1, %s2197_s22  ;;  %s30_s19 = int_to_ptr.vmem [resolvable:$true] %s29_s19 }
   0x5   :  { %p2201_p1 = scmp.lt.u32.totalorder %s2197_s22, %s2559_s1 }
   0x7   :  { %p2203_p2 = pnand %p2201_p1, %p2198_p0 }
   0x9   :  { %2206 = shalt.err (!%p2203_p2)
}
   0xa   :  { %s2207_s27 = scalar_lea.vmem %s30_s19, 4096  ;;  %p2212_p4 = scmp.lt.s32.totalorder %s30_s19, %s30_s19 }
   0xb   :  { %p2208_p3 = scmp.ne.s32.totalorder %s30_s19, %s2207_s27  ;;  %p2213_p5 = scmp.lt.s32.totalorder %s2207_s27, %s2207_s27 }
   0xd   :  { %p2214_p6 = por %p2213_p5, %p2212_p4 }
   0xf   :  { %p2215_p7 = pnand %p2214_p6, %p2208_p3 }
  0x11   :  { %2218 = shalt.err (!%p2215_p7)
}
  0x12   :  { %s2338_s28 = smov 256   ;;  %s2339_s29 = smov 16  }
  0x13   :  { %35 = dma.hbm_to_vmem [thread:$0]  %s2559_s1, 4096, %s30_s19, [#allocation6], %s2338_s28, %s2338_s28, %s2339_s29  }
  0x14   :  { %s2340_s7 = smov [#allocation8]   ;;  %s2219_s11 = scalar_lea.hbm %s2561_s3, 3072 }
  0x15   :  { %s53_s8 = sshll.u32 %s2340_s7, 4  ;;  %p2220_p8 = scmp.ne.s32.totalorder %s2561_s3, %s2219_s11  ;;  %s54_s8 = int_to_ptr.vmem [resolvable:$true] %s53_s8 }
  0x16   :  { %p2223_p9 = scmp.lt.u32.totalorder %s2219_s11, %s2561_s3 }
  0x18   :  { %p2225_p10 = pnand %p2223_p9, %p2220_p8 }
  0x1a   :  { %2228 = shalt.err (!%p2225_p10)
}
  0x1b   :  { %s2229_s16 = scalar_lea.vmem %s54_s8, 3072  ;;  %p2234_p12 = scmp.lt.s32.totalorder %s54_s8, %s54_s8 }
  0x1c   :  { %p2230_p11 = scmp.ne.s32.totalorder %s54_s8, %s2229_s16  ;;  %p2235_p13 = scmp.lt.s32.totalorder %s2229_s16, %s2229_s16 }
  0x1e   :  { %p2236_p0 = por %p2235_p13, %p2234_p12 }
  0x20   :  { %p2237_p1 = pnand %p2236_p0, %p2230_p11 }
  0x22   :  { %2240 = shalt.err (!%p2237_p1)
}
  0x23   :  { %s2341_s1 = smov 64   ;;  %s2342_s17 = smov 4  }
  0x24   :  { %59 = dma.hbm_to_vmem [thread:$0]  %s2561_s3, 3072, %s54_s8, [#allocation9], %s2341_s1, %s2341_s1, %s2342_s17  }
  0x25   :  { %s2343_s20 = smov [#allocation2]   ;;  %s2344_s22 = smov [#allocation7]  }
  0x26   :  { %s20_s21 = sshll.u32 %s2343_s20, 4  ;;  %s41_s23 = sshll.u32 %s2344_s22, 4  ;;  %s21_s21 = int_to_ptr.vmem [resolvable:$true] %s20_s21  ;;  %s2406_s23 = int_to_ptr.vmem [resolvable:$true] %s41_s23 }
  0x27   :  { %s2241_s26 = scalar_lea.hbm %s2558_s0, 64 }
  0x28   :  { %p2242_p2 = scmp.ne.s32.totalorder %s2558_s0, %s2241_s26  ;;  %p2245_p3 = scmp.lt.u32.totalorder %s2241_s26, %s2558_s0 }
  0x2a   :  { %p2247_p4 = pnand %p2245_p3, %p2242_p2 }
  0x2c   :  { %2250 = shalt.err (!%p2247_p4)
}
  0x2d   :  { %s2251_s3 = scalar_lea.vmem %s21_s21, 64  ;;  %p2256_p6 = scmp.lt.s32.totalorder %s21_s21, %s21_s21 }
  0x2e   :  { %p2252_p5 = scmp.ne.s32.totalorder %s21_s21, %s2251_s3  ;;  %p2257_p7 = scmp.lt.s32.totalorder %s2251_s3, %s2251_s3 }
  0x30   :  { %p2258_p8 = por %p2257_p7, %p2256_p6 }
  0x32   :  { %p2259_p9 = pnand %p2258_p8, %p2252_p5 }
  0x34   :  { %2262 = shalt.err (!%p2259_p9)
}
  0x35   :  { %23 = dma.hbm_to_vmem [thread:$0]  %s2558_s0, 64, %s21_s21, [#allocation3]  }
  0x36   :  { %s2263_s10 = scalar_lea.hbm %s2560_s2, 12288 }
  0x37   :  { %p2264_p10 = scmp.ne.s32.totalorder %s2560_s2, %s2263_s10  ;;  %p2267_p11 = scmp.lt.u32.totalorder %s2263_s10, %s2560_s2 }
  0x39   :  { %p2269_p12 = pnand %p2267_p11, %p2264_p10 }
  0x3b   :  { %2272 = shalt.err (!%p2269_p12)
}
  0x3c   :  { %s2273_s15 = scalar_lea.vmem %s2406_s23, 12288  ;;  %p2278_p0 = scmp.lt.s32.totalorder %s2406_s23, %s2406_s23 }
  0x3d   :  { %p2274_p13 = scmp.ne.s32.totalorder %s2406_s23, %s2273_s15  ;;  %p2279_p1 = scmp.lt.s32.totalorder %s2273_s15, %s2273_s15 }
  0x3f   :  { %p2280_p2 = por %p2279_p1, %p2278_p0 }
  0x41   :  { %p2281_p3 = pnand %p2280_p2, %p2274_p13 }
  0x43   :  { %2284 = shalt.err (!%p2281_p3)
}
  0x44   :  { %s2345_s0 = smov 192   ;;  %s2346_s16 = smov 12  }
  0x45   :  { %47 = dma.hbm_to_vmem [thread:$0]  %s2560_s2, 12288, %s2406_s23, [#allocation6], %s2345_s0, %s2345_s0, %s2346_s16  }
  0x46   :  { %s2347_s18 = smov [#allocation10]   ;;  %s2285_s22 = scalar_lea.hbm %s2562_s4, 512 }
  0x47   :  { %s66_s19 = sshll.u32 %s2347_s18, 4  ;;  %p2286_p4 = scmp.ne.s32.totalorder %s2562_s4, %s2285_s22  ;;  %s67_s19 = int_to_ptr.vmem [resolvable:$true] %s66_s19 }
  0x48   :  { %p2289_p5 = scmp.lt.u32.totalorder %s2285_s22, %s2562_s4 }
  0x4a   :  { %p2291_p6 = pnand %p2289_p5, %p2286_p4 }
  0x4c   :  { %2294 = shalt.err (!%p2291_p6)
}
  0x4d   :  { %s2295_s28 = scalar_lea.vmem %s67_s19, 512  ;;  %p2300_p8 = scmp.lt.s32.totalorder %s67_s19, %s67_s19 }
  0x4e   :  { %p2296_p7 = scmp.ne.s32.totalorder %s67_s19, %s2295_s28  ;;  %p2301_p9 = scmp.lt.s32.totalorder %s2295_s28, %s2295_s28 }
  0x50   :  { %p2302_p10 = por %p2301_p9, %p2300_p8 }
  0x52   :  { %p2303_p11 = pnand %p2302_p10, %p2296_p7 }
  0x54   :  { %2306 = shalt.err (!%p2303_p11)
}
  0x55   :  { %69 = dma.hbm_to_vmem [thread:$0]  %s2562_s4, 512, %s67_s19, [#allocation9]  }
  0x56   :  { %2329 = dma.done.wait [#allocation3], 64  }
  0x57   :  { %2330 = vsyncadd [#allocation3], 4294967232 }
  0x58   :  { %2331 = dma.done.wait [#allocation6], 16384  }
  0x59   :  { %2332 = vsyncadd [#allocation6], 4294950912 }
  0x5a   :  { %2333 = dma.done.wait [#allocation9], 3584  }
  0x5b   :  { %2334 = vsyncadd [#allocation9], 4294963712  ;;  %v2348_v0 = vmov 0   ;;  %v1981_v1 = vld [vmem:[#allocation5 + $0x4] ss:$16 sps:$4 sm:$0xff]   ;;  %vm2350_vm0 = vmmov 0  }
  0x5c   :  { %315 = vmatprep.mubr.bf16.mxu0 %v2348_v0  ;;  %356 = vmatprep.mubr.bf16.mxu1 %v2348_v0  ;;  %v1983_v2 = vld [vmem:[#allocation5] ss:$16 sps:$4 sm:$0xff]   ;;  %v1984_v3 = vld [vmem:[#allocation5 + $0x24] ss:$16 sps:$4 sm:$0xff]   ;;  %v1990_v6 = vld [vmem:[#allocation5 + $0xc] ss:$16 sps:$4 sm:$0xff]  }
  0x5d   :  { %283 = vmatprep.subr.bf16.mxu0 %v1981_v1  ;;  %v1986_v4 = vld [vmem:[#allocation5 + $0x20] ss:$16 sps:$4 sm:$0xff]   ;;  %v1987_v5 = vld [vmem:[#allocation5 + $0x44] ss:$16 sps:$4 sm:$0xff]   ;;  %v1992_v7 = vld [vmem:[#allocation5 + $0x8] ss:$16 sps:$4 sm:$0xff]   ;;  %324 = vmatprep.subr.bf16.mxu1 %v1990_v6 }
  0x5e   :  { %284 = vmatpush1.bf16.msra.mxu0 %v1983_v2  ;;  %v1989_v8 = vld [vmem:[#allocation5 + $0x40] ss:$16 sps:$4 sm:$0xff]   ;;  %325 = vmatpush1.bf16.msra.mxu1 %v1992_v7  ;;  %v1996_v9 = vld [vmem:[#allocation5 + $0x2c] ss:$16 sps:$4 sm:$0xff]   ;;  %v1998_v10 = vld [vmem:[#allocation5 + $0x28] ss:$16 sps:$4 sm:$0xff]  }
  0x5f   :  { %285 = vmatprep.subr.bf16.mxu0 %v1984_v3  ;;  %v1993_v11 = vld [vmem:[#allocation5 + $0x64] ss:$16 sps:$4 sm:$0xff]   ;;  %326 = vmatprep.subr.bf16.mxu1 %v1996_v9  ;;  %v1995_v12 = vld [vmem:[#allocation5 + $0x60] ss:$16 sps:$4 sm:$0xff]   ;;  %v2002_v13 = vld [vmem:[#allocation5 + $0x4c] ss:$16 sps:$4 sm:$0xff]  }
  0x60   :  { %v1999_v14 = vld [vmem:[#allocation5 + $0x84] ss:$16 sps:$4 sm:$0xff]   ;;  %v2004_v15 = vld [vmem:[#allocation5 + $0x48] ss:$16 sps:$4 sm:$0xff]   ;;  %v2008_v16 = vld [vmem:[#allocation5 + $0x6c] ss:$16 sps:$4 sm:$0xff]  }
  0x61   :  { %v2001_v17 = vld [vmem:[#allocation5 + $0x80] ss:$16 sps:$4 sm:$0xff]   ;;  %v2005_v18 = vld [vmem:[#allocation5 + $0xa4] ss:$16 sps:$4 sm:$0xff]   ;;  %v2010_v19 = vld [vmem:[#allocation5 + $0x68] ss:$16 sps:$4 sm:$0xff]  }
  0x62   :  { %286 = vmatpush1.bf16.msra.mxu0 %v1986_v4  ;;  %327 = vmatpush1.bf16.msra.mxu1 %v1998_v10  ;;  %v2014_v20 = vld [vmem:[#allocation5 + $0x8c] ss:$16 sps:$4 sm:$0xff]   ;;  %v2007_v21 = vld [vmem:[#allocation5 + $0xa0] ss:$16 sps:$4 sm:$0xff]   ;;  %v2011_v22 = vld [vmem:[#allocation5 + $0xc4] ss:$16 sps:$4 sm:$0xff]  }
  0x63   :  { %287 = vmatprep.subr.bf16.mxu0 %v1987_v5  ;;  %328 = vmatprep.subr.bf16.mxu1 %v2002_v13  ;;  %v2016_v23 = vld [vmem:[#allocation5 + $0x88] ss:$16 sps:$4 sm:$0xff]   ;;  %v2020_v24 = vld [vmem:[#allocation5 + $0xac] ss:$16 sps:$4 sm:$0xff]   ;;  %v2013_v25 = vld [vmem:[#allocation5 + $0xc0] ss:$16 sps:$4 sm:$0xff]  }
  0x64   :  { %v2017_v26 = vld [vmem:[#allocation5 + $0xe4] ss:$16 sps:$4 sm:$0xff]   ;;  %v2022_v27 = vld [vmem:[#allocation5 + $0xa8] ss:$16 sps:$4 sm:$0xff]   ;;  %v2023_v28 = vld [vmem:[#allocation5 + $0xcc] ss:$16 sps:$4 sm:$0xff]  }
  0x65   :  { %v2019_v29 = vld [vmem:[#allocation5 + $0xe0] ss:$16 sps:$4 sm:$0xff]   ;;  %v2025_v30 = vld [vmem:[#allocation5 + $0xc8] ss:$16 sps:$4 sm:$0xff]   ;;  %v2026_v31 = vld [vmem:[#allocation5 + $0xec] ss:$16 sps:$4 sm:$0xff]  }
  0x66   :  { %288 = vmatpush1.bf16.msra.mxu0 %v1989_v8  ;;  %329 = vmatpush1.bf16.msra.mxu1 %v2004_v15  ;;  %v2031_v32 = vld [vmem:[#allocation7 + $0x4] ss:$12 sps:$4 sm:$0xff]   ;;  %v90_v33 = vld [vmem:[#allocation2] sm:$0xf]  ;;  %v2028_v34 = vld [vmem:[#allocation5 + $0xe8] ss:$16 sps:$4 sm:$0xff]  }
  0x67   :  { %289 = vmatprep.subr.bf16.mxu0 %v1993_v11  ;;  %330 = vmatprep.subr.bf16.mxu1 %v2008_v16  ;;  %v2029_v35 = vld [vmem:[#allocation7] ss:$12 sps:$4 sm:$0xff]   ;;  %v2034_v36 = vld [vmem:[#allocation7 + $0x1c] ss:$12 sps:$4 sm:$0xff]   ;;  %v2032_v37 = vld [vmem:[#allocation7 + $0x18] ss:$12 sps:$4 sm:$0xff]  }
  0x68   :  { %v2037_v38 = vld [vmem:[#allocation7 + $0x34] ss:$12 sps:$4 sm:$0xff]   ;;  %v2035_v39 = vld [vmem:[#allocation7 + $0x30] ss:$12 sps:$4 sm:$0xff]   ;;  %v2040_v40 = vld [vmem:[#allocation7 + $0x4c] ss:$12 sps:$4 sm:$0xff]  }
  0x69   :  { %v2038_v41 = vld [vmem:[#allocation7 + $0x48] ss:$12 sps:$4 sm:$0xff]   ;;  %v2043_v42 = vld [vmem:[#allocation7 + $0x64] ss:$12 sps:$4 sm:$0xff]   ;;  %v2041_v43 = vld [vmem:[#allocation7 + $0x60] ss:$12 sps:$4 sm:$0xff]  }
  0x6a   :  { %290 = vmatpush1.bf16.msra.mxu0 %v1995_v12  ;;  %331 = vmatpush1.bf16.msra.mxu1 %v2010_v19  ;;  %v2046_v44 = vld [vmem:[#allocation7 + $0x7c] ss:$12 sps:$4 sm:$0xff]   ;;  %v2044_v45 = vld [vmem:[#allocation7 + $0x78] ss:$12 sps:$4 sm:$0xff]   ;;  %v2049_v46 = vld [vmem:[#allocation7 + $0x94] ss:$12 sps:$4 sm:$0xff]  }
  0x6b   :  { %291 = vmatprep.subr.bf16.mxu0 %v1999_v14  ;;  %332 = vmatprep.subr.bf16.mxu1 %v2014_v20  ;;  %v2047_v47 = vld [vmem:[#allocation7 + $0x90] ss:$12 sps:$4 sm:$0xff]   ;;  %v2052_v48 = vld [vmem:[#allocation7 + $0xac] ss:$12 sps:$4 sm:$0xff]   ;;  %v2050_v49 = vld [vmem:[#allocation7 + $0xa8] ss:$12 sps:$4 sm:$0xff]  }
  0x6c   :  { %v2055_v50 = vld [vmem:[#allocation7 + $0xc4] ss:$12 sps:$4 sm:$0xff]   ;;  %v2056_v51 = vld [vmem:[#allocation7 + $0xc8] ss:$12 sps:$4 sm:$0xff]   ;;  %v2053_v52 = vld [vmem:[#allocation7 + $0xc0] ss:$12 sps:$4 sm:$0xff]  }
  0x6d   :  { %v2057_v53 = vld [vmem:[#allocation7 + $0x8] ss:$12 sps:$4 sm:$0xff]   ;;  %v2061_v55 = vld [vmem:[#allocation7 + $0xe0] ss:$12 sps:$4 sm:$0xff]   ;;  %v2058_v56 = vld [vmem:[#allocation7 + $0xd8] ss:$12 sps:$4 sm:$0xff]  }
  0x6e   :  { %292 = vmatpush1.bf16.msra.mxu0 %v2001_v17  ;;  %333 = vmatpush1.bf16.msra.mxu1 %v2016_v23  ;;  %v2060_v54 = vld [vmem:[#allocation7 + $0xdc] ss:$12 sps:$4 sm:$0xff]   ;;  %v2062_v57 = vld [vmem:[#allocation7 + $0x20] ss:$12 sps:$4 sm:$0xff]   ;;  %v2066_v59 = vld [vmem:[#allocation7 + $0xf8] ss:$12 sps:$4 sm:$0xff]  }
  0x6f   :  { %293 = vmatprep.subr.bf16.mxu0 %v2005_v18  ;;  %334 = vmatprep.subr.bf16.mxu1 %v2020_v24  ;;  %v2065_v58 = vld [vmem:[#allocation7 + $0xf4] ss:$12 sps:$4 sm:$0xff]   ;;  %v2063_v60 = vld [vmem:[#allocation7 + $0xf0] ss:$12 sps:$4 sm:$0xff]   ;;  %v2067_v61 = vld [vmem:[#allocation7 + $0x38] ss:$12 sps:$4 sm:$0xff]  }
  0x70   :  { %v2070_v62 = vld [vmem:[#allocation7 + $0x10c] ss:$12 sps:$4 sm:$0xff]   ;;  %v2071_v63 = vld [vmem:[#allocation7 + $0x110] ss:$12 sps:$4 sm:$0xff]   ;;  %v2068_v0 = vld [vmem:[#allocation7 + $0x108] ss:$12 sps:$4 sm:$0xff]  }
  0x71   :  { %v2072_v1 = vld [vmem:[#allocation7 + $0x50] ss:$12 sps:$4 sm:$0xff]   ;;  %v2076_v3 = vld [vmem:[#allocation7 + $0x128] ss:$12 sps:$4 sm:$0xff]   ;;  %v2073_v4 = vld [vmem:[#allocation7 + $0x120] ss:$12 sps:$4 sm:$0xff]  }
  0x72   :  { %294 = vmatpush1.bf16.msra.mxu0 %v2007_v21  ;;  %335 = vmatpush1.bf16.msra.mxu1 %v2022_v27  ;;  %v2075_v2 = vld [vmem:[#allocation7 + $0x124] ss:$12 sps:$4 sm:$0xff]   ;;  %v2077_v5 = vld [vmem:[#allocation7 + $0x68] ss:$12 sps:$4 sm:$0xff]   ;;  %v2081_v7 = vld [vmem:[#allocation7 + $0x140] ss:$12 sps:$4 sm:$0xff]  }
  0x73   :  { %295 = vmatprep.subr.bf16.mxu0 %v2011_v22  ;;  %336 = vmatprep.subr.bf16.mxu1 %v2023_v28  ;;  %v2080_v6 = vld [vmem:[#allocation7 + $0x13c] ss:$12 sps:$4 sm:$0xff]   ;;  %v2078_v8 = vld [vmem:[#allocation7 + $0x138] ss:$12 sps:$4 sm:$0xff]   ;;  %v2082_v9 = vld [vmem:[#allocation7 + $0x80] ss:$12 sps:$4 sm:$0xff]  }
  0x74   :  { %v2085_v10 = vld [vmem:[#allocation7 + $0x154] ss:$12 sps:$4 sm:$0xff]   ;;  %v2086_v11 = vld [vmem:[#allocation7 + $0x158] ss:$12 sps:$4 sm:$0xff]   ;;  %v2083_v12 = vld [vmem:[#allocation7 + $0x150] ss:$12 sps:$4 sm:$0xff]  }
  0x75   :  { %v2087_v13 = vld [vmem:[#allocation7 + $0x98] ss:$12 sps:$4 sm:$0xff]   ;;  %v2091_v15 = vld [vmem:[#allocation7 + $0x170] ss:$12 sps:$4 sm:$0xff]   ;;  %v2088_v16 = vld [vmem:[#allocation7 + $0x168] ss:$12 sps:$4 sm:$0xff]  }
  0x76   :  { %296 = vmatpush1.bf16.msra.mxu0 %v2013_v25  ;;  %337 = vmatpush1.bf16.msra.mxu1 %v2025_v30  ;;  %v2090_v14 = vld [vmem:[#allocation7 + $0x16c] ss:$12 sps:$4 sm:$0xff]   ;;  %v2092_v17 = vld [vmem:[#allocation7 + $0xb0] ss:$12 sps:$4 sm:$0xff]   ;;  %v2096_v19 = vld [vmem:[#allocation7 + $0x248] ss:$12 sps:$4 sm:$0xff]  }
  0x77   :  { %297 = vmatprep.subr.bf16.mxu0 %v2017_v26  ;;  %338 = vmatprep.subr.bf16.mxu1 %v2026_v31  ;;  %v2095_v18 = vld [vmem:[#allocation7 + $0x184] ss:$12 sps:$4 sm:$0xff]   ;;  %s2351_s4 = smov [#allocation11]  }
  0x78   :  { %s1704_s29 = sshll.u32 %s2351_s4, 4  ;;  %s1705_s29 = int_to_ptr.vmem [resolvable:$true] %s1704_s29 }
  0x79   :  { %s2307_s30 = scalar_lea.vmem %s1705_s29, 128  ;;  %p2312_p13 = scmp.lt.s32.totalorder %s1705_s29, %s1705_s29 }
  0x7a   :  { %298 = vmatpush1.bf16.msra.mxu0 %v2019_v29  ;;  %339 = vmatpush1.bf16.msra.mxu1 %v2028_v34  ;;  %p2308_p12 = scmp.ne.s32.totalorder %s1705_s29, %s2307_s30  ;;  %p2313_p0 = scmp.lt.s32.totalorder %s2307_s30, %s2307_s30 }
  0x7b   :  { %1149 = vmatprep.subr.bf16.mxu0 %v2031_v32  ;;  %1867 = vmatprep.subr.bf16.mxu1 %v2056_v51 }
  0x7c   :  { %p2314_p1 = por %p2313_p0, %p2312_p13 }
  0x7d   :  { %316 = vmatmul.mubr.bf16.vlgmr.msra.gmra.mrb[0].mxu0 %v90_v33  ;;  %357 = vmatmul.mubr.bf16.vlgmr.msra.gmra.mrb[0].mxu1 %v90_v33 }
  0x7e   :  { %1150 = vmatpush1.bf16.msra.mxu0 %v2029_v35  ;;  %1868 = vmatpush3.bf16.msra.mxu1 %v2057_v53  ;;  %p2315_p2 = pnand %p2314_p1, %p2308_p12 }
  0x7f   :  { %1151 = vmatprep.subr.bf16.mxu0 %v2034_v36  ;;  %1869 = vmatprep.subr.bf16.mxu1 %v2061_v55 }
  0x82   :  { %1152 = vmatpush1.bf16.msra.mxu0 %v2032_v37  ;;  %1870 = vmatpush3.bf16.msra.mxu1 %v2062_v57 }
  0x83   :  { %1153 = vmatprep.subr.bf16.mxu0 %v2037_v38  ;;  %1871 = vmatprep.subr.bf16.mxu1 %v2066_v59 }
  0x86   :  { %1154 = vmatpush1.bf16.msra.mxu0 %v2035_v39  ;;  %1872 = vmatpush3.bf16.msra.mxu1 %v2067_v61 }
  0x87   :  { %1155 = vmatprep.subr.bf16.mxu0 %v2040_v40  ;;  %1873 = vmatprep.subr.bf16.mxu1 %v2071_v63 }
  0x8a   :  { %1156 = vmatpush1.bf16.msra.mxu0 %v2038_v41  ;;  %1874 = vmatpush3.bf16.msra.mxu1 %v2072_v1 }
  0x8b   :  { %1157 = vmatprep.subr.bf16.mxu0 %v2043_v42  ;;  %1875 = vmatprep.subr.bf16.mxu1 %v2076_v3 }
  0x8e   :  { %1158 = vmatpush1.bf16.msra.mxu0 %v2041_v43  ;;  %1876 = vmatpush3.bf16.msra.mxu1 %v2077_v5 }
  0x8f   :  { %1159 = vmatprep.subr.bf16.mxu0 %v2046_v44  ;;  %1877 = vmatprep.subr.bf16.mxu1 %v2081_v7 }
  0x92   :  { %1160 = vmatpush1.bf16.msra.mxu0 %v2044_v45  ;;  %1878 = vmatpush3.bf16.msra.mxu1 %v2082_v9 }
  0x93   :  { %1161 = vmatprep.subr.bf16.mxu0 %v2049_v46  ;;  %1879 = vmatprep.subr.bf16.mxu1 %v2086_v11 }
  0x96   :  { %1162 = vmatpush1.bf16.msra.mxu0 %v2047_v47  ;;  %1880 = vmatpush3.bf16.msra.mxu1 %v2087_v13 }
  0x97   :  { %1163 = vmatprep.subr.bf16.mxu0 %v2052_v48  ;;  %1881 = vmatprep.subr.bf16.mxu1 %v2091_v15 }
  0x9a   :  { %1164 = vmatpush1.bf16.msra.mxu0 %v2050_v49  ;;  %1882 = vmatpush3.bf16.msra.mxu1 %v2092_v17 }
  0x9b   :  { %1165 = vmatprep.subr.bf16.mxu0 %v2055_v50  ;;  %1889 = vmatprep.subr.bf16.mxu1 %v2096_v19 }
  0x9e   :  { %1166 = vmatpush1.bf16.msra.mxu0 %v2053_v52 }
  0x9f   :  { %1167 = vmatprep.subr.bf16.mxu0 %v2060_v54 }
  0xa2   :  { %1168 = vmatpush1.bf16.msra.mxu0 %v2058_v56 }
  0xa3   :  { %1169 = vmatprep.subr.bf16.mxu0 %v2065_v58 }
  0xa6   :  { %1170 = vmatpush1.bf16.msra.mxu0 %v2063_v60 }
  0xa7   :  { %1171 = vmatprep.subr.bf16.mxu0 %v2070_v62 }
  0xaa   :  { %1172 = vmatpush1.bf16.msra.mxu0 %v2068_v0 }
  0xab   :  { %1173 = vmatprep.subr.bf16.mxu0 %v2075_v2 }
  0xae   :  { %1174 = vmatpush1.bf16.msra.mxu0 %v2073_v4 }
  0xaf   :  { %1175 = vmatprep.subr.bf16.mxu0 %v2080_v6 }
  0xb2   :  { %1176 = vmatpush1.bf16.msra.mxu0 %v2078_v8 }
  0xb3   :  { %1177 = vmatprep.subr.bf16.mxu0 %v2085_v10 }
  0xb6   :  { %1178 = vmatpush1.bf16.msra.mxu0 %v2083_v12 }
  0xb7   :  { %1179 = vmatprep.subr.bf16.mxu0 %v2090_v14 }
  0xba   :  { %1180 = vmatpush1.bf16.msra.mxu0 %v2088_v16 }
  0xbb   :  { %1190 = vmatprep.subr.bf16.mxu0 %v2095_v18 }
 0x150   :  { %v2449_v20 = vpop.f32.mrb[0].mxu0  ;;  %v2457_v28 = vpop.f32.mrb[0].mxu1 }
 0x151   :  { %v365_v21 = vrot.slane %v2449_v20, 4  ;;  %v2452_v22 = vpop.f32.mrb[1].mxu0  ;;  %v377_v30 = vrot.slane %v2457_v28, 4  ;;  %v2460_v31 = vpop.f32.mrb[1].mxu1 }
 0x152   :  { %v371_v23 = vrot.slane %v2452_v22, 4  ;;  %v321_v24 = vpop.f32.mrb[2].mxu0  ;;  %v383_v33 = vrot.slane %v2460_v31, 4  ;;  %v362_v34 = vpop.f32.mrb[2].mxu1 }
 0x153   :  { %v366_v25 = vadd.f32 %v365_v21, %v2449_v20  ;;  %v322_v26 = vpop.f32.mrb[3].mxu0  ;;  %v378_v36 = vadd.f32 %v377_v30, %v2457_v28  ;;  %v363_v37 = vpop.f32.mrb[3].mxu1 }
 0x154   :  { %v372_v27 = vadd.f32 %v371_v23, %v2452_v22  ;;  %v384_v39 = vadd.f32 %v383_v33, %v2460_v31  ;;  %v2476_v37 = vld [vmem:[#allocation10 + $0x8] sm:$0xff] }
 0x155   :  { %v367_v29 = vrot.slane %v366_v25, 2  ;;  %v379_v41 = vrot.slane %v378_v36, 2 }
 0x156   :  { %v373_v32 = vrot.slane %v372_v27, 2  ;;  %v385_v43 = vrot.slane %v384_v39, 2 }
 0x157   :  { %v368_v35 = vadd.f32 %v367_v29, %v366_v25  ;;  %v380_v45 = vadd.f32 %v379_v41, %v378_v36  ;;  %v2474_v36 = vld [vmem:[#allocation10] sm:$0xff] }
 0x158   :  { %v374_v38 = vadd.f32 %v373_v32, %v372_v27  ;;  %v386_v47 = vadd.f32 %v385_v43, %v384_v39  ;;  %v461_v32 = vlaneseq }
 0x159   :  { %v369_v40 = vrot.slane %v368_v35, 1  ;;  %v381_v49 = vrot.slane %v380_v45, 1 }
 0x15a   :  { %v375_v42 = vrot.slane %v374_v38, 1  ;;  %v387_v51 = vrot.slane %v386_v47, 1 }
 0x15b   :  { %v370_v44 = vadd.f32 %v369_v40, %v368_v35  ;;  %v382_v53 = vadd.f32 %v381_v49, %v380_v45  ;;  %v2472_v35 = vshrl.u32 %v461_v32, 7  ;;  %v89_v45 = vld [vmem:[#allocation10 + $0x18] sm:$0xff] }
 0x15c   :  { %v376_v46 = vadd.f32 %v375_v42, %v374_v38  ;;  %v388_v55 = vadd.f32 %v387_v51, %v386_v47 }
 0x15d   :  { %v389_v48 = vmul.f32 0.125, %v370_v44  ;;  %v2467_v57 = vmul.f32 0.125, %v382_v53  ;;  %v2480_v42 = vsub.s32 0, %v2472_v35  ;;  %v2485_v53 = vsub.s32 1, %v2472_v35 }
 0x15e   :  { %v390_v50 = vmul.f32 0.125, %v376_v46  ;;  %v392_v59 = vmul.f32 0.125, %v388_v55 }
 0x15f   :  { %v393_v52 = vsub.f32 %v2449_v20, %v389_v48  ;;  %v395_v61 = vsub.f32 %v2457_v28, %v2467_v57 }
 0x160   :  { %v394_v54 = vsub.f32 %v2452_v22, %v390_v50  ;;  %v396_v63 = vsub.f32 %v2460_v31, %v392_v59 }
 0x161   :  { %v397_v56 = vmul.f32 %v393_v52, %v393_v52  ;;  %v399_v1 = vmul.f32 %v395_v61, %v395_v61 }
 0x162   :  { %v398_v58 = vmul.f32 %v394_v54, %v394_v54  ;;  %v400_v3 = vmul.f32 %v396_v63, %v396_v63 }
 0x163   :  { %v401_v60 = vrot.slane %v397_v56, 4  ;;  %v413_v5 = vrot.slane %v399_v1, 4 }
 0x164   :  { %v407_v62 = vrot.slane %v398_v58, 4  ;;  %v419_v7 = vrot.slane %v400_v3, 4 }
 0x165   :  { %v402_v0 = vadd.f32 %v401_v60, %v397_v56  ;;  %v414_v9 = vadd.f32 %v413_v5, %v399_v1 }
 0x166   :  { %v408_v2 = vadd.f32 %v407_v62, %v398_v58  ;;  %v420_v11 = vadd.f32 %v419_v7, %v400_v3 }
 0x167   :  { %v403_v4 = vrot.slane %v402_v0, 2  ;;  %v415_v16 = vrot.slane %v414_v9, 2 }
 0x168   :  { %v409_v6 = vrot.slane %v408_v2, 2  ;;  %v421_v14 = vrot.slane %v420_v11, 2 }
 0x169   :  { %v404_v8 = vadd.f32 %v403_v4, %v402_v0  ;;  %v416_v25 = vadd.f32 %v415_v16, %v414_v9  ;;  %v2093_v9 = vld [vmem:[#allocation7 + $0x180] ss:$12 sps:$4 sm:$0xff]  }
 0x16a   :  { %v410_v10 = vadd.f32 %v409_v6, %v408_v2  ;;  %v422_v18 = vadd.f32 %v421_v14, %v420_v11  ;;  %v2497_v14 = vld [vmem:[#allocation10 + $0x10] sm:$0xff]  ;;  %v2102_v16 = vld [vmem:[#allocation7 + $0x1a0] ss:$12 sps:$4 sm:$0xff]  }
 0x16b   :  { %v405_v12 = vrot.slane %v404_v8, 1  ;;  %v417_v30 = vrot.slane %v416_v25, 1 }
 0x16c   :  { %v411_v13 = vrot.slane %v410_v10, 1  ;;  %v423_v23 = vrot.slane %v422_v18, 1 }
 0x16d   :  { %v406_v15 = vadd.f32 %v405_v12, %v404_v8  ;;  %v418_v34 = vadd.f32 %v417_v30, %v416_v25  ;;  %v2100_v12 = vld [vmem:[#allocation7 + $0x19c] ss:$12 sps:$4 sm:$0xff]  }
 0x16e   :  { %v412_v17 = vadd.f32 %v411_v13, %v410_v10  ;;  %v424_v27 = vadd.f32 %v423_v23, %v422_v18  ;;  %v2097_v10 = vld [vmem:[#allocation7 + $0x188] ss:$12 sps:$4 sm:$0xff]   ;;  %v2101_v13 = vld [vmem:[#allocation7 + $0x260] ss:$12 sps:$4 sm:$0xff]   ;;  %v2103_v23 = vld [vmem:[#allocation7 + $0x1b0] ss:$12 sps:$4 sm:$0xff]  }
 0x16f   :  { %v425_v19 = vmul.f32 0.125, %v406_v15  ;;  %v427_v39 = vmul.f32 0.125, %v418_v34  ;;  %v2112_v30 = vld [vmem:[#allocation7 + $0x1d0] ss:$12 sps:$4 sm:$0xff]   ;;  %v2116_v34 = vld [vmem:[#allocation7 + $0x2a8] ss:$12 sps:$4 sm:$0xff]  }
 0x170   :  { %v426_v21 = vmul.f32 0.125, %v412_v17  ;;  %v428_v29 = vmul.f32 0.125, %v424_v27  ;;  %v2111_v27 = vld [vmem:[#allocation7 + $0x290] ss:$12 sps:$4 sm:$0xff]  }
 0x171   :  { %v429_v24 = vadd.f32 1e-05, %v425_v19  ;;  %v431_v47 = vadd.f32 1e-05, %v427_v39  ;;  %v2105_v19 = vld [vmem:[#allocation7 + $0x1b4] ss:$12 sps:$4 sm:$0xff]  }
 0x172   :  { %v430_v26 = vadd.f32 1e-05, %v426_v21  ;;  %v432_v33 = vadd.f32 1e-05, %v428_v29  ;;  %v2106_v21 = vld [vmem:[#allocation7 + $0x278] ss:$12 sps:$4 sm:$0xff]  }
 0x173   :  { %2181 = vrsqrt.f32 %v429_v24  ;;  %v2107_v24 = vld [vmem:[#allocation7 + $0x1b8] ss:$12 sps:$4 sm:$0xff]   ;;  %v2108_v29 = vld [vmem:[#allocation7 + $0x1c8] ss:$12 sps:$4 sm:$0xff]  }
 0x174   :  { %2183 = vrsqrt.f32 %v430_v26  ;;  %v2110_v26 = vld [vmem:[#allocation7 + $0x1cc] ss:$12 sps:$4 sm:$0xff]   ;;  %v2117_v39 = vld [vmem:[#allocation7 + $0x1e8] ss:$12 sps:$4 sm:$0xff]  }
 0x175   :  { %2185 = vrsqrt.f32 %v432_v33  ;;  %v2115_v33 = vld [vmem:[#allocation7 + $0x1e4] ss:$12 sps:$4 sm:$0xff]  }
 0x176   :  { %2187 = vrsqrt.f32 %v431_v47 }
 0x17d   :  { %v2182_v38 = vpop.eup %2181 }
 0x17e   :  { %v2184_v40 = vpop.eup %2183  ;;  %v437_v41 = vmul.f32 %v2182_v38, %v2474_v36  ;;  %v2113_v38 = vld [vmem:[#allocation7 + $0x1e0] ss:$12 sps:$4 sm:$0xff]  }
 0x17f   :  { %v438_v43 = vmul.f32 %v2184_v40, %v2476_v37  ;;  %v2186_v49 = vpop.eup %2185 }
 0x180   :  { %v441_v44 = vmul.f32 %v437_v41, %v389_v48  ;;  %v464_v52 = vrot.slane %v437_v41, %v2480_v42  ;;  %v440_v56 = vmul.f32 %v2186_v49, %v89_v45  ;;  %v2120_v41 = vld [vmem:[#allocation7 + $0x1fc] ss:$12 sps:$4 sm:$0xff]   ;;  %v2125_v49 = vld [vmem:[#allocation7 + $0x214] ss:$12 sps:$4 sm:$0xff]  }
 0x181   :  { %v442_v46 = vmul.f32 %v438_v43, %v390_v50  ;;  %v468_v55 = vrot.slane %v438_v43, %v2480_v42  ;;  %v2121_v43 = vld [vmem:[#allocation7 + $0x2c0] ss:$12 sps:$4 sm:$0xff]  }
 0x182   :  { %v449_v51 = vrot.slane %v441_v44, 7  ;;  %v444_v60 = vmul.f32 %v440_v56, %v392_v59  ;;  %v476_v48 = vrot.slane %v440_v56, %v2480_v42  ;;  %v477_v61 = vmul.f32 %v464_v52, %v2449_v20  ;;  %v2118_v44 = vld [vmem:[#allocation7 + $0x1f8] ss:$12 sps:$4 sm:$0xff]   ;;  %v2123_v52 = vld [vmem:[#allocation7 + $0x210] ss:$12 sps:$4 sm:$0xff]  }
 0x183   :  { %v450_v54 = vrot.slane %v442_v46, 7  ;;  %v478_v63 = vmul.f32 %v468_v55, %v2452_v22  ;;  %v2188_v22 = vpop.eup %2187  ;;  %v2130_v55 = vld [vmem:[#allocation7 + $0x22c] ss:$12 sps:$4 sm:$0xff]   ;;  %v2131_v56 = vld [vmem:[#allocation7 + $0x2f0] ss:$12 sps:$4 sm:$0xff]  }
 0x184   :  { %v457_v58 = vsub.f32 %v2474_v36, %v449_v51  ;;  %v452_v0 = vrot.slane %v444_v60, 7  ;;  %v480_v3 = vmul.f32 %v476_v48, %v2460_v31  ;;  %v2098_v31 = vld [vmem:[#allocation7 + $0x198] ss:$12 sps:$4 sm:$0xff]   ;;  %v439_v18 = vmul.f32 %v2188_v22, %v2497_v14  ;;  %v2132_v60 = vld [vmem:[#allocation7 + $0x230] ss:$12 sps:$4 sm:$0xff]  }
 0x185   :  { %v458_v50 = vsub.f32 %v2476_v37, %v450_v54  ;;  %v2126_v51 = vld [vmem:[#allocation7 + $0x2d8] ss:$12 sps:$4 sm:$0xff]   ;;  %v2133_v48 = vld [vmem:[#allocation7 + $0x240] ss:$12 sps:$4 sm:$0xff]   ;;  %v2162_v22 = vld [vmem:[#allocation8 + $0x10] sm:$0xff]  }
 0x186   :  { %v484_v62 = vrot.slane %v457_v58, %v2485_v53  ;;  %v460_v5 = vsub.f32 %v89_v45, %v452_v0  ;;  %v443_v25 = vmul.f32 %v439_v18, %v2467_v57  ;;  %v472_v57 = vrot.slane %v439_v18, %v2480_v42  ;;  %v2122_v45 = vld [vmem:[#allocation7 + $0x200] ss:$12 sps:$4 sm:$0xff]   ;;  %v2127_v42 = vld [vmem:[#allocation7 + $0x218] ss:$12 sps:$4 sm:$0xff]   ;;  %v2128_v58 = vld [vmem:[#allocation7 + $0x228] ss:$12 sps:$4 sm:$0xff]  }
 0x187   :  { %v488_v1 = vrot.slane %v458_v50, %v2485_v53  ;;  %v2139_v0 = vld [vmem:[#allocation7 + $0x270] ss:$12 sps:$4 sm:$0xff]   ;;  %v2167_v18 = vld [vmem:[#allocation8 + $0x68] sm:$0xff]  }
 0x188   :  { %v497_v2 = vadd.f32 %v484_v62, %v477_v61  ;;  %v496_v7 = vrot.slane %v460_v5, %v2485_v53  ;;  %v451_v32 = vrot.slane %v443_v25, 7  ;;  %v479_v46 = vmul.f32 %v472_v57, %v2457_v28  ;;  %v2135_v28 = vld [vmem:[#allocation7 + $0x244] ss:$12 sps:$4 sm:$0xff]   ;;  %v2138_v61 = vld [vmem:[#allocation7 + $0x25c] ss:$12 sps:$4 sm:$0xff]  }
 0x189   :  { %v498_v4 = vadd.f32 %v488_v1, %v478_v63  ;;  %v2136_v62 = vld [vmem:[#allocation7 + $0x258] ss:$12 sps:$4 sm:$0xff]   ;;  %v2141_v63 = vld [vmem:[#allocation7 + $0x274] ss:$12 sps:$4 sm:$0xff]   ;;  %v2150_v5 = vld [vmem:[#allocation7 + $0x2bc] ss:$12 sps:$4 sm:$0xff]  }
 0x18a   :  { %v501_v6 = vmax.f32 %v497_v2, 0.0  ;;  %v500_v20 = vadd.f32 %v496_v7, %v480_v3  ;;  %v459_v40 = vsub.f32 %v2497_v14, %v451_v32  ;;  %v2144_v1 = vld [vmem:[#allocation7 + $0x28c] ss:$12 sps:$4 sm:$0xff]   ;;  %v2142_v2 = vld [vmem:[#allocation7 + $0x288] ss:$12 sps:$4 sm:$0xff]  }
 0x18b   :  { %v502_v59 = vmax.f32 %v498_v4, 0.0  ;;  %v2147_v3 = vld [vmem:[#allocation7 + $0x2a4] ss:$12 sps:$4 sm:$0xff]   ;;  %v2145_v4 = vld [vmem:[#allocation7 + $0x2a0] ss:$12 sps:$4 sm:$0xff]   ;;  %v2172_v25 = vld [vmem:[#allocation8 + $0x38] sm:$0xff]  }
 0x18c   :  { %v505_v11 = vpack.c.bf16 %v501_v6, %v501_v6  ;;  %v504_v15 = vmax.f32 %v500_v20, 0.0  ;;  %v492_v47 = vrot.slane %v459_v40, %v2485_v53  ;;  %v2148_v6 = vld [vmem:[#allocation7 + $0x2b8] ss:$12 sps:$4 sm:$0xff]   ;;  %v2151_v7 = vld [vmem:[#allocation7 + $0x2d0] ss:$12 sps:$4 sm:$0xff]  }
 0x18d   :  { %v506_v8 = vpack.c.bf16 %v502_v59, %v502_v59  ;;  %v2153_v59 = vld [vmem:[#allocation7 + $0x2d4] ss:$12 sps:$4 sm:$0xff]  }
 0x18e   :  { %v508_v17 = vpack.c.bf16 %v504_v15, %v504_v15  ;;  %v499_v54 = vadd.f32 %v492_v47, %v479_v46  ;;  %v2158_v20 = vld [vmem:[#allocation8] sm:$0xff]   ;;  %v2163_v15 = vld [vmem:[#allocation8 + $0x58] sm:$0xff]  }
 0x18f   :  { %1181 = vmatprep.mubr.bf16.mxu0 %v506_v8  ;;  %1263 = vmatprep.mubr.bf16.mxu1 %v506_v8  ;;  %v2156_v8 = vld [vmem:[#allocation7 + $0x2ec] ss:$12 sps:$4 sm:$0xff]  }
 0x190   :  { %1182 = vmatmul.mubr.bf16.vlgmr.msra.gmra.mrb[4].mxu0 %v505_v11  ;;  %1264 = vmatmul.mubr.bf16.vlgmr.msra.gmra.mrb[4].mxu1 %v505_v11  ;;  %v503_v53 = vmax.f32 %v499_v54, 0.0  ;;  %v2159_v11 = vld [vmem:[#allocation8 + $0x48] sm:$0xff]  }
 0x191   :  { %1191 = vmatpush1.bf16.msra.mxu0 %v2093_v9  ;;  %1890 = vmatpush3.bf16.msra.mxu1 %v2097_v10  ;;  %v2154_v9 = vld [vmem:[#allocation7 + $0x2e8] ss:$12 sps:$4 sm:$0xff]   ;;  %v2157_v10 = vld [vmem:[#allocation8 + $0x40] sm:$0xff]  }
 0x192   :  { %1192 = vmatprep.subr.bf16.mxu0 %v2100_v12  ;;  %1891 = vmatprep.subr.bf16.mxu1 %v2101_v13  ;;  %v507_v50 = vpack.c.bf16 %v503_v53, %v503_v53  ;;  %v2160_v12 = vld [vmem:[#allocation8 + $0x8] sm:$0xff]   ;;  %v2161_v13 = vld [vmem:[#allocation8 + $0x50] sm:$0xff]  }
 0x193   :  { %1222 = vmatprep.mubr.bf16.mxu0 %v508_v17  ;;  %1303 = vmatprep.mubr.bf16.mxu1 %v508_v17  ;;  %v2166_v17 = vld [vmem:[#allocation8 + $0x20] sm:$0xff]  }
 0x195   :  { %1193 = vmatpush1.bf16.msra.mxu0 %v2098_v31  ;;  %1892 = vmatpush3.bf16.msra.mxu1 %v2102_v16  ;;  %v2164_v31 = vld [vmem:[#allocation8 + $0x18] sm:$0xff]   ;;  %v2165_v16 = vld [vmem:[#allocation8 + $0x60] sm:$0xff]  }
 0x196   :  { %1194 = vmatprep.subr.bf16.mxu0 %v2105_v19  ;;  %1893 = vmatprep.subr.bf16.mxu1 %v2106_v21  ;;  %v2168_v19 = vld [vmem:[#allocation8 + $0x28] sm:$0xff]   ;;  %v2169_v21 = vld [vmem:[#allocation8 + $0x70] sm:$0xff]  }
 0x199   :  { %1195 = vmatpush1.bf16.msra.mxu0 %v2103_v23  ;;  %1894 = vmatpush3.bf16.msra.mxu1 %v2107_v24  ;;  %v2170_v23 = vld [vmem:[#allocation8 + $0x30] sm:$0xff]   ;;  %v2171_v24 = vld [vmem:[#allocation8 + $0x78] sm:$0xff]  }
 0x19a   :  { %1196 = vmatprep.subr.bf16.mxu0 %v2110_v26  ;;  %1895 = vmatprep.subr.bf16.mxu1 %v2111_v27  ;;  %v2349_v26 = vmov 0.0  }
 0x19d   :  { %1197 = vmatpush1.bf16.msra.mxu0 %v2108_v29  ;;  %1896 = vmatpush3.bf16.msra.mxu1 %v2112_v30 }
 0x19e   :  { %1198 = vmatprep.subr.bf16.mxu0 %v2115_v33  ;;  %1897 = vmatprep.subr.bf16.mxu1 %v2116_v34 }
 0x1a1   :  { %1199 = vmatpush1.bf16.msra.mxu0 %v2113_v38  ;;  %1898 = vmatpush3.bf16.msra.mxu1 %v2117_v39 }
 0x1a2   :  { %1200 = vmatprep.subr.bf16.mxu0 %v2120_v41  ;;  %1899 = vmatprep.subr.bf16.mxu1 %v2121_v43 }
 0x1a5   :  { %1201 = vmatpush1.bf16.msra.mxu0 %v2118_v44  ;;  %1900 = vmatpush3.bf16.msra.mxu1 %v2122_v45 }
 0x1a6   :  { %1202 = vmatprep.subr.bf16.mxu0 %v2125_v49  ;;  %1901 = vmatprep.subr.bf16.mxu1 %v2126_v51 }
 0x1a9   :  { %1203 = vmatpush1.bf16.msra.mxu0 %v2123_v52  ;;  %1902 = vmatpush3.bf16.msra.mxu1 %v2127_v42 }
 0x1aa   :  { %1204 = vmatprep.subr.bf16.mxu0 %v2130_v55  ;;  %1903 = vmatprep.subr.bf16.mxu1 %v2131_v56 }
 0x1ad   :  { %1205 = vmatpush1.bf16.msra.mxu0 %v2128_v58  ;;  %1904 = vmatpush3.bf16.msra.mxu1 %v2132_v60 }
 0x1ae   :  { %1206 = vmatprep.subr.bf16.mxu0 %v2135_v28  ;;  %1911 = vmatprep.subr.bf16.mxu1 %v2157_v10 }
 0x1b0   :  { %1304 = vmatmul.mubr.bf16.vlgmr.msra.gmra.mrb[8].mxu1 %v507_v50 }
 0x1b1   :  { %1207 = vmatpush1.bf16.msra.mxu0 %v2133_v48  ;;  %1912 = vmatpush3.bf16.msra.mxu1 %v2158_v20 }
 0x1b2   :  { %1208 = vmatprep.subr.bf16.mxu0 %v2138_v61  ;;  %1913 = vmatprep.subr.bf16.mxu1 %v2159_v11 }
 0x1b5   :  { %1209 = vmatpush1.bf16.msra.mxu0 %v2136_v62  ;;  %1914 = vmatpush3.bf16.msra.mxu1 %v2160_v12 }
 0x1b6   :  { %1210 = vmatprep.subr.bf16.mxu0 %v2141_v63  ;;  %1915 = vmatprep.subr.bf16.mxu1 %v2161_v13 }
 0x1b9   :  { %1211 = vmatpush1.bf16.msra.mxu0 %v2139_v0  ;;  %1916 = vmatpush3.bf16.msra.mxu1 %v2162_v22 }
 0x1ba   :  { %1212 = vmatprep.subr.bf16.mxu0 %v2144_v1  ;;  %1917 = vmatprep.subr.bf16.mxu1 %v2163_v15 }
 0x1bd   :  { %1213 = vmatpush1.bf16.msra.mxu0 %v2142_v2  ;;  %1918 = vmatpush3.bf16.msra.mxu1 %v2164_v31 }
 0x1be   :  { %1214 = vmatprep.subr.bf16.mxu0 %v2147_v3  ;;  %1919 = vmatprep.subr.bf16.mxu1 %v2165_v16 }
 0x1c1   :  { %1215 = vmatpush1.bf16.msra.mxu0 %v2145_v4  ;;  %1920 = vmatpush3.bf16.msra.mxu1 %v2166_v17 }
 0x1c2   :  { %1216 = vmatprep.subr.bf16.mxu0 %v2150_v5  ;;  %1921 = vmatprep.subr.bf16.mxu1 %v2167_v18 }
 0x1c5   :  { %1217 = vmatpush1.bf16.msra.mxu0 %v2148_v6  ;;  %1922 = vmatpush3.bf16.msra.mxu1 %v2168_v19 }
 0x1c6   :  { %1218 = vmatprep.subr.bf16.mxu0 %v2153_v59  ;;  %1923 = vmatprep.subr.bf16.mxu1 %v2169_v21 }
 0x1c9   :  { %1219 = vmatpush1.bf16.msra.mxu0 %v2151_v7  ;;  %1924 = vmatpush3.bf16.msra.mxu1 %v2170_v23 }
 0x1ca   :  { %1220 = vmatprep.subr.bf16.mxu0 %v2156_v8  ;;  %1925 = vmatprep.subr.bf16.mxu1 %v2171_v24 }
 0x1cd   :  { %1221 = vmatpush1.bf16.msra.mxu0 %v2154_v9  ;;  %1926 = vmatpush3.bf16.msra.mxu1 %v2172_v25 }
 0x1ce   :  { %1942 = vmatprep.subr.bf16.mxu1 %v2349_v26 }
 0x1d0   :  { %1223 = vmatmul.mubr.bf16.vlgmr.msra.gmra.mrb[4].mxu0 %v507_v50 }
 0x263   :  { %v1883_v27 = vpop.f32.mrb[4].mxu1 }
 0x264   :  { %v1884_v29 = vpop.f32.mrb[5].mxu1 }
 0x265   :  { %v1885_v30 = vadd.f32 %v1884_v29, %v1883_v27  ;;  %v1886_v32 = vpop.f32.mrb[6].mxu1 }
 0x266   :  { %v1887_v33 = vpop.f32.mrb[7].mxu1 }
 0x283   :  { %v1905_v34 = vpop.f32.mrb[8].mxu1 }
 0x284   :  { %v1906_v38 = vpop.f32.mrb[9].mxu1 }
 0x285   :  { %v1907_v39 = vadd.f32 %v1906_v38, %v1905_v34  ;;  %v1908_v40 = vpop.f32.mrb[10].mxu1 }
 0x286   :  { %v1909_v57 = vpop.f32.mrb[11].mxu1 }
 0x287   :  { %v2506_v41 = vadd.f32 %v1907_v39, %v1885_v30 }
 0x289   :  { %v1323_v43 = vrot.slane %v2506_v41, 4 }
 0x28b   :  { %v1324_v44 = vadd.f32 %v1323_v43, %v2506_v41 }
 0x28d   :  { %v1325_v45 = vrot.slane %v1324_v44, 2 }
 0x28f   :  { %v1326_v46 = vadd.f32 %v1325_v45, %v1324_v44  ;;  %v1385_v44 = vsub.s32 2, %v2472_v35 }
 0x291   :  { %v1327_v49 = vrot.slane %v1326_v46, 1 }
 0x293   :  { %v1328_v60 = vadd.f32 %v1327_v49, %v1326_v46 }
 0x295   :  { %v2518_v61 = vmul.f32 0.125, %v1328_v60 }
 0x297   :  { %v1334_v2 = vsub.f32 %v2506_v41, %v2518_v61 }
 0x299   :  { %v1337_v59 = vmul.f32 %v1334_v2, %v1334_v2  ;;  %v2173_v2 = vld [vmem:[#allocation8 + $0x80] sm:$0xff]  }
 0x29b   :  { %v1350_v20 = vrot.slane %v1337_v59, 4 }
 0x29d   :  { %v1351_v15 = vadd.f32 %v1350_v20, %v1337_v59 }
 0x29f   :  { %v1352_v19 = vrot.slane %v1351_v15, 2 }
 0x2a1   :  { %v1353_v27 = vadd.f32 %v1352_v19, %v1351_v15 }
 0x2a3   :  { %v2510_v47 = vpop.f32.mrb[4].mxu0  ;;  %v1354_v32 = vrot.slane %v1353_v27, 1 }
 0x2a4   :  { %v1311_v51 = vrot.slane %v2510_v47, 4  ;;  %v2513_v52 = vpop.f32.mrb[5].mxu0 }
 0x2a5   :  { %v1317_v42 = vrot.slane %v2513_v52, 4  ;;  %v1228_v54 = vpop.f32.mrb[6].mxu0  ;;  %v1355_v33 = vadd.f32 %v1354_v32, %v1353_v27 }
 0x2a6   :  { %v1312_v55 = vadd.f32 %v1311_v51, %v2510_v47  ;;  %v1229_v56 = vpop.f32.mrb[7].mxu0 }
 0x2a7   :  { %v1318_v58 = vadd.f32 %v1317_v42, %v2513_v52  ;;  %v1358_v38 = vmul.f32 0.125, %v1355_v33  ;;  %v1400_v56 = vsub.s32 3, %v2472_v35 }
 0x2a8   :  { %v1313_v28 = vrot.slane %v1312_v55, 2 }
 0x2a9   :  { %v1319_v53 = vrot.slane %v1318_v58, 2  ;;  %v1361_v45 = vadd.f32 1e-05, %v1358_v38 }
 0x2aa   :  { %v1314_v48 = vadd.f32 %v1313_v28, %v1312_v55 }
 0x2ab   :  { %v1320_v50 = vadd.f32 %v1319_v53, %v1318_v58 }
 0x2ac   :  { %v1315_v62 = vrot.slane %v1314_v48, 1 }
 0x2ad   :  { %v1321_v63 = vrot.slane %v1320_v50, 1 }
 0x2ae   :  { %v1316_v0 = vadd.f32 %v1315_v62, %v1314_v48 }
 0x2af   :  { %v1322_v1 = vadd.f32 %v1321_v63, %v1320_v50 }
 0x2b0   :  { %v1329_v3 = vmul.f32 0.125, %v1316_v0 }
 0x2b1   :  { %v1330_v4 = vmul.f32 0.125, %v1322_v1 }
 0x2b2   :  { %v1332_v5 = vsub.f32 %v2510_v47, %v1329_v3 }
 0x2b3   :  { %v1333_v6 = vsub.f32 %v2513_v52, %v1330_v4 }
 0x2b4   :  { %v1335_v7 = vmul.f32 %v1332_v5, %v1332_v5  ;;  %v2174_v5 = vld [vmem:[#allocation8 + $0x88] sm:$0xff]  }
 0x2b5   :  { %v1336_v8 = vmul.f32 %v1333_v6, %v1333_v6  ;;  %v2176_v6 = vld [vmem:[#allocation8 + $0x98] sm:$0xff]  }
 0x2b6   :  { %v1338_v9 = vrot.slane %v1335_v7, 4 }
 0x2b7   :  { %v1344_v10 = vrot.slane %v1336_v8, 4 }
 0x2b8   :  { %v1339_v11 = vadd.f32 %v1338_v9, %v1335_v7  ;;  %v2177_v7 = vld [vmem:[#allocation8 + $0xa0] sm:$0xff]  }
 0x2b9   :  { %v1345_v12 = vadd.f32 %v1344_v10, %v1336_v8  ;;  %v2178_v10 = vld [vmem:[#allocation8 + $0xa8] sm:$0xff]  }
 0x2ba   :  { %v1340_v13 = vrot.slane %v1339_v11, 2 }
 0x2bb   :  { %v1346_v22 = vrot.slane %v1345_v12, 2 }
 0x2bc   :  { %v1341_v31 = vadd.f32 %v1340_v13, %v1339_v11  ;;  %v2179_v11 = vld [vmem:[#allocation8 + $0xb0] sm:$0xff]   ;;  %v2180_v13 = vld [vmem:[#allocation8 + $0xb8] sm:$0xff]  }
 0x2bd   :  { %v1347_v16 = vadd.f32 %v1346_v22, %v1345_v12 }
 0x2be   :  { %v1342_v17 = vrot.slane %v1341_v31, 1 }
 0x2bf   :  { %v1348_v18 = vrot.slane %v1347_v16, 1 }
 0x2c0   :  { %v1343_v21 = vadd.f32 %v1342_v17, %v1341_v31 }
 0x2c1   :  { %v1349_v23 = vadd.f32 %v1348_v18, %v1347_v16 }
 0x2c2   :  { %v1356_v24 = vmul.f32 0.125, %v1343_v21 }
 0x2c3   :  { %v1357_v25 = vmul.f32 0.125, %v1349_v23 }
 0x2c4   :  { %v1359_v29 = vadd.f32 1e-05, %v1356_v24 }
 0x2c5   :  { %v1360_v30 = vadd.f32 1e-05, %v1357_v25 }
 0x2c6   :  { %2189 = vrsqrt.f32 %v1359_v29 }
 0x2c7   :  { %2191 = vrsqrt.f32 %v1360_v30 }
 0x2c8   :  { %2193 = vrsqrt.f32 %v1361_v45 }
 0x2d0   :  { %v2190_v34 = vpop.eup %2189 }
 0x2d1   :  { %v2192_v39 = vpop.eup %2191  ;;  %v1365_v40 = vmul.f32 %v2190_v34, %v2474_v36 }
 0x2d2   :  { %v1366_v57 = vmul.f32 %v2192_v39, %v2476_v37 }
 0x2d3   :  { %v1368_v43 = vmul.f32 %v1365_v40, %v1329_v3  ;;  %v1386_v51 = vrot.slane %v1365_v40, %v1385_v44 }
 0x2d4   :  { %v1369_v46 = vmul.f32 %v1366_v57, %v1330_v4  ;;  %v1390_v54 = vrot.slane %v1366_v57, %v1385_v44  ;;  %v2194_v4 = vpop.eup %2193 }
 0x2d5   :  { %v1374_v49 = vrot.slane %v1368_v43, 7  ;;  %v1395_v60 = vmul.f32 %v1386_v51, %v2510_v47  ;;  %v2175_v47 = vld [vmem:[#allocation8 + $0x90] sm:$0xff]  }
 0x2d6   :  { %v1375_v42 = vrot.slane %v1369_v46, 7  ;;  %v1396_v53 = vmul.f32 %v1390_v54, %v2513_v52 }
 0x2d7   :  { %v1380_v55 = vsub.f32 %v2474_v36, %v1374_v49 }
 0x2d8   :  { %v1381_v58 = vsub.f32 %v2476_v37, %v1375_v42  ;;  %v1367_v37 = vmul.f32 %v2194_v4, %v2497_v14 }
 0x2d9   :  { %v1401_v28 = vrot.slane %v1380_v55, %v1400_v56 }
 0x2da   :  { %v1405_v48 = vrot.slane %v1381_v58, %v1400_v56  ;;  %v1370_v52 = vmul.f32 %v1367_v37, %v2518_v61  ;;  %v1394_v9 = vrot.slane %v1367_v37, %v1385_v44 }
 0x2db   :  { %v1410_v50 = vadd.f32 %v1401_v28, %v1395_v60 }
 0x2dc   :  { %v1411_v62 = vadd.f32 %v1405_v48, %v1396_v53  ;;  %v1376_v59 = vrot.slane %v1370_v52, 7  ;;  %v1397_v61 = vmul.f32 %v1394_v9, %v2506_v41  ;;  %v1469_v41 = vsub.s32 4, %v2472_v35 }
 0x2dd   :  { %v1413_v63 = vmax.f32 %v1410_v50, 0.0 }
 0x2de   :  { %v1414_v0 = vmax.f32 %v1411_v62, 0.0  ;;  %v1382_v8 = vsub.f32 %v2497_v14, %v1376_v59  ;;  %v1470_v19 = vrot.slane %v2474_v36, %v1469_v41 }
 0x2df   :  { %v1416_v3 = vpack.c.bf16 %v1413_v63, %v1413_v63 }
 0x2e0   :  { %v1417_v1 = vpack.c.bf16 %v1414_v0, %v1414_v0  ;;  %v1409_v20 = vrot.slane %v1382_v8, %v1400_v56 }
 0x2e2   :  { %1647 = vmatprep.mubr.bf16.mxu1 %v1417_v1  ;;  %v1412_v12 = vadd.f32 %v1409_v20, %v1397_v61 }
 0x2e3   :  { %1648 = vmatmul.mubr.bf16.vlgmr.msra.gmra.mrb[12].mxu1 %v1416_v3 }
 0x2e4   :  { %1943 = vmatpush3.bf16.msra.mxu1 %v2173_v2  ;;  %1958 = vmatprep.mubr.msk.bf16.mxu1 %vm2350_vm0, %v2349_v26  ;;  %v1415_v22 = vmax.f32 %v1412_v12, 0.0 }
 0x2e5   :  { %1944 = vmatprep.subr.bf16.mxu1 %v2349_v26 }
 0x2e6   :  { %v1418_v14 = vpack.c.bf16 %v1415_v22, %v1415_v22 }
 0x2e8   :  { %1945 = vmatpush3.bf16.msra.mxu1 %v2174_v5 }
 0x2e9   :  { %1946 = vmatprep.subr.bf16.mxu1 %v2349_v26 }
 0x2ec   :  { %1947 = vmatpush3.bf16.msra.mxu1 %v2175_v47 }
 0x2ed   :  { %1948 = vmatprep.subr.bf16.mxu1 %v2349_v26 }
 0x2f0   :  { %1949 = vmatpush3.bf16.msra.mxu1 %v2176_v6 }
 0x2f1   :  { %1950 = vmatprep.subr.bf16.mxu1 %v2349_v26 }
 0x2f4   :  { %1951 = vmatpush3.bf16.msra.mxu1 %v2177_v7 }
 0x2f5   :  { %1952 = vmatprep.subr.bf16.mxu1 %v2349_v26 }
 0x2f8   :  { %1953 = vmatpush3.bf16.msra.mxu1 %v2178_v10 }
 0x2f9   :  { %1954 = vmatprep.subr.bf16.mxu1 %v2349_v26 }
 0x2fc   :  { %1955 = vmatpush3.bf16.msra.mxu1 %v2179_v11 }
 0x2fd   :  { %1956 = vmatprep.subr.bf16.mxu1 %v2349_v26 }
 0x300   :  { %1957 = vmatpush3.bf16.msra.mxu1 %v2180_v13 }
 0x303   :  { %1959 = vmatmul.mubr.bf16.vlgmr.msra.gmra.mrb[16].mxu1 %v1418_v14 }
 0x3b6   :  { %v1927_v15 = vpop.f32.mrb[12].mxu1 }
 0x3b7   :  { %v1928_v31 = vpop.f32.mrb[13].mxu1 }
 0x3b8   :  { %v1929_v16 = vadd.f32 %v1928_v31, %v1927_v15  ;;  %v1930_v17 = vpop.f32.mrb[14].mxu1 }
 0x3b9   :  { %v1931_v18 = vpop.f32.mrb[15].mxu1 }
 0x3ba   :  { %v1650_v21 = vadd.f32 %v1929_v16, %v1470_v19 }
 0x3d6   :  { %v1689_v23 = vpop.f32.mrb[16].mxu1 }
 0x3d7   :  { %v1690_v24 = vadd.f32 %v1689_v23, %v1650_v21  ;;  %v1960_v25 = vpop.f32.mrb[17].mxu1 }
 0x3d8   :  { %v1692_v27 = vpop.f32.mrb[18].mxu1 }
 0x3d9   :  { %2195 = vtanh.f32 %v1690_v24  ;;  %v1961_v26 = vpop.f32.mrb[19].mxu1 }
 0x3e3   :  { %v2196_v29 = vpop.eup %2195 }
 0x3e4   :  { %v1696_v30 = vmul.f32 2.0, %v2196_v29 }
 0x3e6   :  { %1697 = vst [vmem:[#allocation11] sm:$0xff] %v1696_v30 }
 0x3e7   :  { %2318 = shalt.err (!%p2315_p2)
}
 0x3e8   :  { %s2319_s7 = scalar_lea.hbm %s2563_s5, 128 }
 0x3e9   :  { %p2320_p3 = scmp.ne.s32.totalorder %s2563_s5, %s2319_s7  ;;  %p2323_p4 = scmp.lt.u32.totalorder %s2319_s7, %s2563_s5 }
 0x3eb   :  { %p2325_p5 = pnand %p2323_p4, %p2320_p3 }
 0x3ed   :  { %2328 = shalt.err (!%p2325_p5)
}
 0x3ee   :  { %1707 = dma.vmem_to_hbm [thread:$0]  %s1705_s29, 128, %s2563_s5, [#allocation4]  }
 0x3ef   :  { %2335 = dma.done.wait [#allocation4], 128  }
 0x3f0   :  { %2336 = vsyncadd [#allocation4], 4294967168 }
 0x3f1   :  { %1711 = vsyncpa [#allocation3], 1 }
 0x3f2   :  { %1712 = vsyncpa [#allocation6], 1 }
 0x3f3   :  { %1713 = vsyncpa [#allocation9], 1 }
 0x3f4   :  { %1714 = vsyncpa [#allocation4], 1 }

</bundles_post_ra>
